<compile_context>
chip_gen: v7x
topology: tpu7x:2x2x1
jax: 0.10.0
libtpu: 0.0.40
codegen_flags: <defaults>
</compile_context>

<pallas_src>
import jax
import jax.numpy as jnp
from jax import lax
from jax.experimental import pallas as pl
from jax.experimental.pallas import tpu as pltpu

NEG_SLOPE = 0.02      # nn.LeakyReLU(negative_slope=0.02)
PAD_RC2 = 3           # residual_connection2 has kernel_size=7 -> padding 3


def _leaky_relu(x):
    return jnp.where(x > 0, x, NEG_SLOPE * x)


def _vmem_capacity_bytes():
    """Per-core VMEM capacity; conservative (v7x) fallback if the query is unavailable."""
    try:
        return int(pltpu.get_tpu_info().vmem_capacity_bytes)
    except Exception:
        return 64 << 20


def _peak_vmem_bytes(bt, L, Cin, Cout, pad_max, cdt_size, weight_bytes, out_size=4):
    """Rough peak VMEM for one grid step with batch tile bt."""
    cmax = max(Cin, Cout)
    m = bt * L
    blk_in = 2 * bt * L * Cin * 4                        # double-buffered f32 input block
    blk_out = 2 * bt * L * Cout * out_size               # double-buffered output block
    scratch = bt * (L + 2 * pad_max) * cmax * cdt_size   # zero-padded staging scratch
    # largest in-flight temporaries: one per-tap window (compute dtype) plus the f32
    # conv accumulator / residual / activation (M, Cout) values live at once.
    temps = m * cmax * cdt_size + 3 * m * Cout * 4
    return blk_in + blk_out + scratch + 2 * weight_bytes + temps


def _pick_batch_tile(B, L, Cin, Cout, pad_max, cdt_size, weight_bytes, budget):
    """Largest divisor Bt of B (capped at B//2 so the grid has >= 2 steps) whose modeled
    peak VMEM fits the budget; prefer an MXU-friendly M = Bt*L once it is large enough."""
    max_bt = B // 2 if B >= 2 else 1
    divisors = [d for d in range(1, max_bt + 1) if B % d == 0]
    fitting = [d for d in divisors
               if _peak_vmem_bytes(d, L, Cin, Cout, pad_max, cdt_size, weight_bytes) <= budget]
    if not fitting:
        return 1
    good = [d for d in fitting if (d * L) % 256 == 0 and d * L >= 4096]
    return min(good) if good else max(fitting)


def _make_kernel(Bt, L, Cin, Cout, K, pad_max, compute_dtype):
    M = Bt * L

    def kernel(x_ref, wf1_ref, bf1_ref, wf2a_ref, bf2a_ref, wf2b_ref, bf2b_ref,
               wr1_ref, br1_ref, wfr2_ref, br2_ref, o_ref, xpad_ref):
        cmax = xpad_ref.shape[-1]

        # Zero only the halo rows (2*pad_max rows); interior rows are always staged
        # before they are read.  Re-done every step for megacore correctness (see header).
        halo = jnp.zeros((Bt, pad_max, cmax), xpad_ref.dtype)
        xpad_ref[:, :pad_max, :] = halo
        xpad_ref[:, pad_max + L:, :] = halo

        def stage(v2, c):
            # v2: (M, c) f32 value -> interior rows, first c channels of the scratch.
            xpad_ref[:, pad_max:pad_max + L, :c] = (
                v2.reshape(Bt, L, c).astype(xpad_ref.dtype))

        def conv(ksize, c, w_ref, b_ref):
            # 'same' conv over the currently staged input (first c channels) as ksize
            # per-tap MXU matmuls accumulated in f32 -- no materialized im2col temp.
            pad = ksize // 2
            base = pad_max - pad
            acc = None
            for k in range(ksize):
                win = xpad_ref[:, base + k: base + k + L, :c].reshape(M, c)
                part = jnp.dot(win, w_ref[k], preferred_element_type=jnp.float32)
                acc = part if acc is None else acc + part
            return acc + b_ref[...]

        x = x_ref[...].astype(jnp.float32).reshape(M, Cin)

        # ---- stage 1: residual_connection1 (1x1 -> plain matmul), conv1 (+bn1 folded)
        residual = jnp.dot(x.astype(compute_dtype), wr1_ref[0],
                           preferred_element_type=jnp.float32) + br1_ref[...]
        stage(x, Cin)
        out = conv(K, Cin, wf1_ref, bf1_ref)
        out = _leaky_relu(out + residual)                 # dropout1: identity (eval)

        # ---- stage 2: residual_connection2 (k=7) and conv2 (+bn1 folded again, as in
        #      the original module); both read the same single staging of `out`.
        stage(out, Cout)
        residual = residual + conv(7, Cout, wfr2_ref, br2_ref)
        out = conv(K, Cout, wf2a_ref, bf2a_ref)
        out = _leaky_relu(out + residual)                 # dropout2: identity (eval)

        # ---- stage 3: residual_connection2 and conv2 (+bn2 folded)
        stage(out, Cout)
        residual = residual + conv(7, Cout, wfr2_ref, br2_ref)
        out = conv(K, Cout, wf2b_ref, bf2b_ref)
        out = _leaky_relu(out + residual)                 # dropout3: identity (eval)

        o_ref[...] = out.reshape(Bt, L, Cout).astype(o_ref.dtype)

    return kernel


def residual_block_forward(x_ncl, params, kernel_size, *,
                           compute_dtype=jnp.bfloat16, out_dtype=jnp.float32,
                           batch_tile=None):
    """x_ncl: (B, Cin, L) like PyTorch.  Returns (B, Cout, L) in `out_dtype`.

    compute_dtype: dtype of the matmul operands and the staging scratch (bf16 default:
    bf16-native MXU on v5e/v6e/v7x); accumulation and elementwise math stay f32.
    """
    B, Cin, L = x_ncl.shape
    K = kernel_size
    Cout = params["w1"].shape[2]
    cmax = max(Cin, Cout)
    pad_max = max(K // 2, PAD_RC2)

    x = jnp.transpose(x_ncl, (0, 2, 1)).astype(jnp.float32)       # (B, L, Cin)

    # Fold BN scale into the conv weight (broadcast over output channels) and BN shift +
    # conv bias into the bias.  Weights stay (K, Cin, Cout): one tile set per tap.
    def fuse(w_kio, scale=None):
        w = w_kio if scale is None else w_kio * scale
        return w.astype(compute_dtype)

    bn1s, bn1h = params["bn1_scale"], params["bn1_shift"]
    bn2s, bn2h = params["bn2_scale"], params["bn2_shift"]
    wf1, bf1 = fuse(params["w1"], bn1s), params["b1"] * bn1s + bn1h
    wf2a, bf2a = fuse(params["w2"], bn1s), params["b2"] * bn1s + bn1h   # module reuses bn1
    wf2b, bf2b = fuse(params["w2"], bn2s), params["b2"] * bn2s + bn2h
    wr1, br1 = fuse(params["wr1"]), params["br1"]
    wfr2, br2 = fuse(params["wr2"]), params["br2"]
    weights = (wf1, bf1, wf2a, bf2a, wf2b, bf2b, wr1, br1, wfr2, br2)
    weight_bytes = sum(int(w.size) * w.dtype.itemsize for w in weights)

    cdt_size = jnp.dtype(compute_dtype).itemsize
    out_size = jnp.dtype(out_dtype).itemsize
    capacity = _vmem_capacity_bytes()
    if batch_tile is not None:
        Bt = batch_tile
    else:
        Bt = _pick_batch_tile(B, L, Cin, Cout, pad_max, cdt_size, weight_bytes,
                              budget=capacity // 2)
    assert B % Bt == 0
    grid = (B // Bt,)

    peak = _peak_vmem_bytes(Bt, L, Cin, Cout, pad_max, cdt_size, weight_bytes, out_size)
    vmem_limit = int(min(int(0.75 * capacity), max(2 * peak, 32 << 20)))

    def full_spec(arr):
        nd = arr.ndim
        return pl.BlockSpec(arr.shape, lambda i, _nd=nd: (0,) * _nd)

    in_specs = [pl.BlockSpec((Bt, L, Cin), lambda i: (i, 0, 0))]
    in_specs += [full_spec(w) for w in weights]

    Mtot = B * L
    flops = int(2 * Mtot * (K * Cin * Cout + Cin * Cout
                            + 2 * 7 * Cout * Cout + 2 * K * Cout * Cout))
    bytes_accessed = int(4 * Mtot * Cin + out_size * Mtot * Cout + weight_bytes)

    kernel = _make_kernel(Bt, L, Cin, Cout, K, pad_max, compute_dtype)

    out = pl.pallas_call(
        kernel,
        out_shape=jax.ShapeDtypeStruct((B, L, Cout), out_dtype),
        grid=grid,
        in_specs=in_specs,
        out_specs=pl.BlockSpec((Bt, L, Cout), lambda i: (i, 0, 0)),
        scratch_shapes=[pltpu.VMEM((Bt, L + 2 * pad_max, cmax), compute_dtype)],
        compiler_params=pltpu.CompilerParams(dimension_semantics=("parallel",),
                                             vmem_limit_bytes=vmem_limit),
        cost_estimate=pl.CostEstimate(flops=flops, transcendentals=0,
                                      bytes_accessed=bytes_accessed),
    )(x, *weights)

    return jnp.transpose(out, (0, 2, 1))                           # back to (B, Cout, L)


# ----------------------------- parameter setup (glue) -----------------------------

def init_params(key, in_channels, out_channels, kernel_size, stride):
    assert stride == 1, "residual adds require stride == 1"
    assert kernel_size % 2 == 1, "padding = kernel_size // 2 gives 'same' only for odd k"
    ks = jax.random.split(key, 12)

    def conv_w(k, cout, cin, ksz):
        bound = 1.0 / jnp.sqrt(cin * ksz)
        w = jax.random.uniform(k, (cout, cin, ksz), jnp.float32, -bound, bound)
        return jnp.transpose(w, (2, 1, 0))                # (K, Cin, Cout)

    def conv_b(k, cout, cin, ksz):
        bound = 1.0 / jnp.sqrt(cin * ksz)
        return jax.random.uniform(k, (1, cout), jnp.float32, -bound, bound)

    eps = 1e-5
    gamma1 = jax.random.uniform(ks[8], (1, out_channels), jnp.float32, 0.5, 1.5)
    beta1 = 0.1 * jax.random.normal(ks[9], (1, out_channels), jnp.float32)
    gamma2 = jax.random.uniform(ks[10], (1, out_channels), jnp.float32, 0.5, 1.5)
    beta2 = 0.1 * jax.random.normal(ks[11], (1, out_channels), jnp.float32)
    # running_mean = 0, running_var = 1 (PyTorch defaults), folded to scale/shift
    bn1_scale = gamma1 / jnp.sqrt(1.0 + eps)
    bn1_shift = beta1
    bn2_scale = gamma2 / jnp.sqrt(1.0 + eps)
    bn2_shift = beta2

    return dict(
        w1=conv_w(ks[0], out_channels, in_channels, kernel_size),
        b1=conv_b(ks[1], out_channels, in_channels, kernel_size),
        w2=conv_w(ks[2], out_channels, out_channels, kernel_size),
        b2=conv_b(ks[3], out_channels, out_channels, kernel_size),
        wr1=conv_w(ks[4], out_channels, in_channels, 1),
        br1=conv_b(ks[5], out_channels, in_channels, 1),
        wr2=conv_w(ks[6], out_channels, out_channels, 7),
        br2=conv_b(ks[7], out_channels, out_channels, 7),
        bn1_scale=bn1_scale, bn1_shift=bn1_shift,
        bn2_scale=bn2_scale, bn2_shift=bn2_shift,
    )


# ----------------------------- pure-JAX reference -----------------------------

def _conv_ref(x_nlc, w_kio, b):
    pad = w_kio.shape[0] // 2
    y = lax.conv_general_dilated(
        x_nlc, w_kio, window_strides=(1,), padding=[(pad, pad)],
        dimension_numbers=("NWC", "WIO", "NWC"),
        precision=lax.Precision.HIGHEST)
    return y + b[None]


def forward_ref(x_ncl, p):
    x = jnp.transpose(x_ncl, (0, 2, 1)).astype(jnp.float32)
    lrelu = lambda t: jnp.where(t > 0, t, NEG_SLOPE * t)
    residual = _conv_ref(x, p["wr1"], p["br1"])
    out = _conv_ref(x, p["w1"], p["b1"]) * p["bn1_scale"][None] + p["bn1_shift"][None]
    out = lrelu(out + residual)
    residual = residual + _conv_ref(out, p["wr2"], p["br2"])
    out = _conv_ref(out, p["w2"], p["b2"]) * p["bn1_scale"][None] + p["bn1_shift"][None]
    out = lrelu(out + residual)
    residual = residual + _conv_ref(out, p["wr2"], p["br2"])
    out = _conv_ref(out, p["w2"], p["b2"]) * p["bn2_scale"][None] + p["bn2_shift"][None]
    out = lrelu(out + residual)
    return jnp.transpose(out, (0, 2, 1))


if __name__ == "__main__":
    B, Cin, Cout, L = 2, 4, 8, 16
    kernel_size, stride = 3, 1

    key = jax.random.PRNGKey(0)
    pkey, xkey = jax.random.split(key)
    params = init_params(pkey, Cin, Cout, kernel_size, stride)
    x = jax.random.normal(xkey, (B, Cin, L), jnp.float32)   # PyTorch NCL input

    y_ref = forward_ref(x, params)

    # f32 operands: strict numerical check of the kernel structure.
    y32 = residual_block_forward(x, params, kernel_size, compute_dtype=jnp.float32)
    y32 = jax.block_until_ready(y32)
    assert y32.shape == (B, Cout, L)
    d32 = float(jnp.max(jnp.abs(y32 - y_ref)))
    assert d32 < 1e-2, f"f32 mismatch vs reference: max |diff| = {d32}"

    # bf16 operands (the performance default): loose check.
    y16 = residual_block_forward(x, params, kernel_size)     # compute_dtype=bf16
    y16 = jax.block_until_ready(y16)
    d16 = float(jnp.max(jnp.abs(y16 - y_ref)))
    assert d16 < 1e-1, f"bf16 mismatch vs reference: max |diff| = {d16}"

    print("KERNEL_OK")
</pallas_src>

<mosaic_0001>
module attributes {stable_mosaic.version = 11 : i64} {
  func.func @kernel(%arg0: i32, %arg1: memref<1x16x4xf32, #tpu.memory_space<vmem>>, %arg2: memref<3x4x8xf32, #tpu.memory_space<vmem>>, %arg3: memref<1x8xf32, #tpu.memory_space<vmem>>, %arg4: memref<3x8x8xf32, #tpu.memory_space<vmem>>, %arg5: memref<1x8xf32, #tpu.memory_space<vmem>>, %arg6: memref<3x8x8xf32, #tpu.memory_space<vmem>>, %arg7: memref<1x8xf32, #tpu.memory_space<vmem>>, %arg8: memref<1x4x8xf32, #tpu.memory_space<vmem>>, %arg9: memref<1x8xf32, #tpu.memory_space<vmem>>, %arg10: memref<7x8x8xf32, #tpu.memory_space<vmem>>, %arg11: memref<1x8xf32, #tpu.memory_space<vmem>>, %arg12: memref<1x16x8xf32, #tpu.memory_space<vmem>>, %arg13: memref<1x22x8xf32, #tpu.memory_space<vmem>>) attributes {dimension_semantics = [#tpu.dimension_semantics<parallel>], iteration_bounds = array<i64: 2>, scalar_prefetch = 0 : i64, scratch_operands = 1 : i64, tpu.core_type = #tpu.core_type<tc>, window_params = [{transform_indices = @transform_0, window_bounds = array<i64: 1, 16, 4>}, {pipeline_mode = #tpu.pipeline_mode<synchronous>, transform_indices = @transform_1, window_bounds = array<i64: 3, 4, 8>}, {pipeline_mode = #tpu.pipeline_mode<synchronous>, transform_indices = @transform_2, window_bounds = array<i64: 1, 8>}, {pipeline_mode = #tpu.pipeline_mode<synchronous>, transform_indices = @transform_3, window_bounds = array<i64: 3, 8, 8>}, {pipeline_mode = #tpu.pipeline_mode<synchronous>, transform_indices = @transform_4, window_bounds = array<i64: 1, 8>}, {pipeline_mode = #tpu.pipeline_mode<synchronous>, transform_indices = @transform_5, window_bounds = array<i64: 3, 8, 8>}, {pipeline_mode = #tpu.pipeline_mode<synchronous>, transform_indices = @transform_6, window_bounds = array<i64: 1, 8>}, {pipeline_mode = #tpu.pipeline_mode<synchronous>, transform_indices = @transform_7, window_bounds = array<i64: 1, 4, 8>}, {pipeline_mode = #tpu.pipeline_mode<synchronous>, transform_indices = @transform_8, window_bounds = array<i64: 1, 8>}, {pipeline_mode = #tpu.pipeline_mode<synchronous>, transform_indices = @transform_9, window_bounds = array<i64: 7, 8, 8>}, {pipeline_mode = #tpu.pipeline_mode<synchronous>, transform_indices = @transform_10, window_bounds = array<i64: 1, 8>}, {transform_indices = @transform_11, window_bounds = array<i64: 1, 16, 8>}]} {
    %cst = arith.constant 0.000000e+00 : f32
    %0 = vector.broadcast %cst : f32 to vector<1x3x8xf32>
    %c0 = arith.constant 0 : index
    %c0_0 = arith.constant 0 : index
    %c0_1 = arith.constant 0 : index
    %1 = vector.load %arg13[%c0, %c0_0, %c0_1] : memref<1x22x8xf32, #tpu.memory_space<vmem>>, vector<1x3x8xf32>
    tpu.vector_store %arg13[%c0, %c0_0, %c0_1], %0 {strides = array<i32>} : memref<1x22x8xf32, #tpu.memory_space<vmem>>, vector<1x3x8xf32>,
    %c0_2 = arith.constant 0 : index
    %c19 = arith.constant 19 : index
    %c0_3 = arith.constant 0 : index
    %2 = vector.load %arg13[%c0_2, %c19, %c0_3] : memref<1x22x8xf32, #tpu.memory_space<vmem>>, vector<1x3x8xf32>
    tpu.vector_store %arg13[%c0_2, %c19, %c0_3], %0 {strides = array<i32>} : memref<1x22x8xf32, #tpu.memory_space<vmem>>, vector<1x3x8xf32>,
    %c0_4 = arith.constant 0 : index
    %c0_5 = arith.constant 0 : index
    %c0_6 = arith.constant 0 : index
    %3 = vector.load %arg1[%c0_4, %c0_5, %c0_6] : memref<1x16x4xf32, #tpu.memory_space<vmem>>, vector<1x16x4xf32>
    %4 = vector.shape_cast %3 : vector<1x16x4xf32> to vector<16x4xf32>
    %c0_7 = arith.constant 0 : index
    %c0_8 = arith.constant 0 : index
    %c0_9 = arith.constant 0 : index
    %5 = vector.load %arg8[%c0_7, %c0_8, %c0_9] : memref<1x4x8xf32, #tpu.memory_space<vmem>>, vector<1x4x8xf32>
    %6 = vector.shape_cast %5 : vector<1x4x8xf32> to vector<4x8xf32>
    %cst_10 = arith.constant dense<0.000000e+00> : vector<16x8xf32>
    %7 = tpu.matmul %4, %6, %cst_10 {dimension_numbers = #tpu.dot_dimension_numbers<[1], [0], [0], [1], [0, 0, 1, 1], [], []>} : vector<16x4xf32>, vector<4x8xf32>, vector<16x8xf32> -> vector<16x8xf32>
    %c0_11 = arith.constant 0 : index
    %c0_12 = arith.constant 0 : index
    %8 = vector.load %arg9[%c0_11, %c0_12] : memref<1x8xf32, #tpu.memory_space<vmem>>, vector<1x8xf32>
    %9 = vector.broadcast %8 : vector<1x8xf32> to vector<16x8xf32>
    %10 = arith.addf %7, %9 : vector<16x8xf32>
    %11 = vector.shape_cast %4 : vector<16x4xf32> to vector<1x16x4xf32>
    %c0_13 = arith.constant 0 : index
    %c3 = arith.constant 3 : index
    %c0_14 = arith.constant 0 : index
    %12 = vector.load %arg13[%c0_13, %c3, %c0_14] : memref<1x22x8xf32, #tpu.memory_space<vmem>>, vector<1x16x4xf32>
    tpu.vector_store %arg13[%c0_13, %c3, %c0_14], %11 {strides = array<i32>} : memref<1x22x8xf32, #tpu.memory_space<vmem>>, vector<1x16x4xf32>,
    %c0_15 = arith.constant 0 : index
    %c2 = arith.constant 2 : index
    %c0_16 = arith.constant 0 : index
    %13 = vector.load %arg13[%c0_15, %c2, %c0_16] : memref<1x22x8xf32, #tpu.memory_space<vmem>>, vector<1x16x4xf32>
    %14 = vector.shape_cast %13 : vector<1x16x4xf32> to vector<16x4xf32>
    %c0_17 = arith.constant 0 : index
    %c0_18 = arith.constant 0 : index
    %c0_19 = arith.constant 0 : index
    %15 = vector.load %arg2[%c0_17, %c0_18, %c0_19] : memref<3x4x8xf32, #tpu.memory_space<vmem>>, vector<1x4x8xf32>
    %16 = vector.shape_cast %15 : vector<1x4x8xf32> to vector<4x8xf32>
    %cst_20 = arith.constant dense<0.000000e+00> : vector<16x8xf32>
    %17 = tpu.matmul %14, %16, %cst_20 {dimension_numbers = #tpu.dot_dimension_numbers<[1], [0], [0], [1], [0, 0, 1, 1], [], []>} : vector<16x4xf32>, vector<4x8xf32>, vector<16x8xf32> -> vector<16x8xf32>
    %c0_21 = arith.constant 0 : index
    %c3_22 = arith.constant 3 : index
    %c0_23 = arith.constant 0 : index
    %18 = vector.load %arg13[%c0_21, %c3_22, %c0_23] : memref<1x22x8xf32, #tpu.memory_space<vmem>>, vector<1x16x4xf32>
    %19 = vector.shape_cast %18 : vector<1x16x4xf32> to vector<16x4xf32>
    %c1 = arith.constant 1 : index
    %c0_24 = arith.constant 0 : index
    %c0_25 = arith.constant 0 : index
    %20 = vector.load %arg2[%c1, %c0_24, %c0_25] : memref<3x4x8xf32, #tpu.memory_space<vmem>>, vector<1x4x8xf32>
    %21 = vector.shape_cast %20 : vector<1x4x8xf32> to vector<4x8xf32>
    %cst_26 = arith.constant dense<0.000000e+00> : vector<16x8xf32>
    %22 = tpu.matmul %19, %21, %cst_26 {dimension_numbers = #tpu.dot_dimension_numbers<[1], [0], [0], [1], [0, 0, 1, 1], [], []>} : vector<16x4xf32>, vector<4x8xf32>, vector<16x8xf32> -> vector<16x8xf32>
    %23 = arith.addf %17, %22 : vector<16x8xf32>
    %c0_27 = arith.constant 0 : index
    %c4 = arith.constant 4 : index
    %c0_28 = arith.constant 0 : index
    %24 = vector.load %arg13[%c0_27, %c4, %c0_28] : memref<1x22x8xf32, #tpu.memory_space<vmem>>, vector<1x16x4xf32>
    %25 = vector.shape_cast %24 : vector<1x16x4xf32> to vector<16x4xf32>
    %c2_29 = arith.constant 2 : index
    %c0_30 = arith.constant 0 : index
    %c0_31 = arith.constant 0 : index
    %26 = vector.load %arg2[%c2_29, %c0_30, %c0_31] : memref<3x4x8xf32, #tpu.memory_space<vmem>>, vector<1x4x8xf32>
    %27 = vector.shape_cast %26 : vector<1x4x8xf32> to vector<4x8xf32>
    %cst_32 = arith.constant dense<0.000000e+00> : vector<16x8xf32>
    %28 = tpu.matmul %25, %27, %cst_32 {dimension_numbers = #tpu.dot_dimension_numbers<[1], [0], [0], [1], [0, 0, 1, 1], [], []>} : vector<16x4xf32>, vector<4x8xf32>, vector<16x8xf32> -> vector<16x8xf32>
    %29 = arith.addf %23, %28 : vector<16x8xf32>
    %c0_33 = arith.constant 0 : index
    %c0_34 = arith.constant 0 : index
    %30 = vector.load %arg3[%c0_33, %c0_34] : memref<1x8xf32, #tpu.memory_space<vmem>>, vector<1x8xf32>
    %31 = vector.broadcast %30 : vector<1x8xf32> to vector<16x8xf32>
    %32 = arith.addf %29, %31 : vector<16x8xf32>
    %33 = arith.addf %32, %10 : vector<16x8xf32>
    %cst_35 = arith.constant 0.000000e+00 : f32
    %34 = vector.broadcast %cst_35 : f32 to vector<16x8xf32>
    %35 = arith.cmpf ogt, %33, %34 : vector<16x8xf32>
    %cst_36 = arith.constant 2.000000e-02 : f32
    %36 = vector.broadcast %cst_36 : f32 to vector<16x8xf32>
    %37 = arith.mulf %36, %33 : vector<16x8xf32>
    %38 = arith.select %35, %33, %37 : vector<16x8xi1>, vector<16x8xf32>
    %39 = vector.shape_cast %38 : vector<16x8xf32> to vector<1x16x8xf32>
    %c0_37 = arith.constant 0 : index
    %c3_38 = arith.constant 3 : index
    %c0_39 = arith.constant 0 : index
    %40 = vector.load %arg13[%c0_37, %c3_38, %c0_39] : memref<1x22x8xf32, #tpu.memory_space<vmem>>, vector<1x16x8xf32>
    tpu.vector_store %arg13[%c0_37, %c3_38, %c0_39], %39 {strides = array<i32>} : memref<1x22x8xf32, #tpu.memory_space<vmem>>, vector<1x16x8xf32>,
    %c0_40 = arith.constant 0 : index
    %c0_41 = arith.constant 0 : index
    %c0_42 = arith.constant 0 : index
    %41 = vector.load %arg13[%c0_40, %c0_41, %c0_42] : memref<1x22x8xf32, #tpu.memory_space<vmem>>, vector<1x16x8xf32>
    %42 = vector.shape_cast %41 : vector<1x16x8xf32> to vector<16x8xf32>
    %c0_43 = arith.constant 0 : index
    %c0_44 = arith.constant 0 : index
    %c0_45 = arith.constant 0 : index
    %43 = vector.load %arg10[%c0_43, %c0_44, %c0_45] : memref<7x8x8xf32, #tpu.memory_space<vmem>>, vector<1x8x8xf32>
    %44 = vector.shape_cast %43 : vector<1x8x8xf32> to vector<8x8xf32>
    %cst_46 = arith.constant dense<0.000000e+00> : vector<16x8xf32>
    %45 = tpu.matmul %42, %44, %cst_46 {dimension_numbers = #tpu.dot_dimension_numbers<[1], [0], [0], [1], [0, 0, 1, 1], [], []>} : vector<16x8xf32>, vector<8x8xf32>, vector<16x8xf32> -> vector<16x8xf32>
    %c0_47 = arith.constant 0 : index
    %c1_48 = arith.constant 1 : index
    %c0_49 = arith.constant 0 : index
    %46 = vector.load %arg13[%c0_47, %c1_48, %c0_49] : memref<1x22x8xf32, #tpu.memory_space<vmem>>, vector<1x16x8xf32>
    %47 = vector.shape_cast %46 : vector<1x16x8xf32> to vector<16x8xf32>
    %c1_50 = arith.constant 1 : index
    %c0_51 = arith.constant 0 : index
    %c0_52 = arith.constant 0 : index
    %48 = vector.load %arg10[%c1_50, %c0_51, %c0_52] : memref<7x8x8xf32, #tpu.memory_space<vmem>>, vector<1x8x8xf32>
    %49 = vector.shape_cast %48 : vector<1x8x8xf32> to vector<8x8xf32>
    %cst_53 = arith.constant dense<0.000000e+00> : vector<16x8xf32>
    %50 = tpu.matmul %47, %49, %cst_53 {dimension_numbers = #tpu.dot_dimension_numbers<[1], [0], [0], [1], [0, 0, 1, 1], [], []>} : vector<16x8xf32>, vector<8x8xf32>, vector<16x8xf32> -> vector<16x8xf32>
    %51 = arith.addf %45, %50 : vector<16x8xf32>
    %c0_54 = arith.constant 0 : index
    %c2_55 = arith.constant 2 : index
    %c0_56 = arith.constant 0 : index
    %52 = vector.load %arg13[%c0_54, %c2_55, %c0_56] : memref<1x22x8xf32, #tpu.memory_space<vmem>>, vector<1x16x8xf32>
    %53 = vector.shape_cast %52 : vector<1x16x8xf32> to vector<16x8xf32>
    %c2_57 = arith.constant 2 : index
    %c0_58 = arith.constant 0 : index
    %c0_59 = arith.constant 0 : index
    %54 = vector.load %arg10[%c2_57, %c0_58, %c0_59] : memref<7x8x8xf32, #tpu.memory_space<vmem>>, vector<1x8x8xf32>
    %55 = vector.shape_cast %54 : vector<1x8x8xf32> to vector<8x8xf32>
    %cst_60 = arith.constant dense<0.000000e+00> : vector<16x8xf32>
    %56 = tpu.matmul %53, %55, %cst_60 {dimension_numbers = #tpu.dot_dimension_numbers<[1], [0], [0], [1], [0, 0, 1, 1], [], []>} : vector<16x8xf32>, vector<8x8xf32>, vector<16x8xf32> -> vector<16x8xf32>
    %57 = arith.addf %51, %56 : vector<16x8xf32>
    %c0_61 = arith.constant 0 : index
    %c3_62 = arith.constant 3 : index
    %c0_63 = arith.constant 0 : index
    %58 = vector.load %arg13[%c0_61, %c3_62, %c0_63] : memref<1x22x8xf32, #tpu.memory_space<vmem>>, vector<1x16x8xf32>
    %59 = vector.shape_cast %58 : vector<1x16x8xf32> to vector<16x8xf32>
    %c3_64 = arith.constant 3 : index
    %c0_65 = arith.constant 0 : index
    %c0_66 = arith.constant 0 : index
    %60 = vector.load %arg10[%c3_64, %c0_65, %c0_66] : memref<7x8x8xf32, #tpu.memory_space<vmem>>, vector<1x8x8xf32>
    %61 = vector.shape_cast %60 : vector<1x8x8xf32> to vector<8x8xf32>
    %cst_67 = arith.constant dense<0.000000e+00> : vector<16x8xf32>
    %62 = tpu.matmul %59, %61, %cst_67 {dimension_numbers = #tpu.dot_dimension_numbers<[1], [0], [0], [1], [0, 0, 1, 1], [], []>} : vector<16x8xf32>, vector<8x8xf32>, vector<16x8xf32> -> vector<16x8xf32>
    %63 = arith.addf %57, %62 : vector<16x8xf32>
    %c0_68 = arith.constant 0 : index
    %c4_69 = arith.constant 4 : index
    %c0_70 = arith.constant 0 : index
    %64 = vector.load %arg13[%c0_68, %c4_69, %c0_70] : memref<1x22x8xf32, #tpu.memory_space<vmem>>, vector<1x16x8xf32>
    %65 = vector.shape_cast %64 : vector<1x16x8xf32> to vector<16x8xf32>
    %c4_71 = arith.constant 4 : index
    %c0_72 = arith.constant 0 : index
    %c0_73 = arith.constant 0 : index
    %66 = vector.load %arg10[%c4_71, %c0_72, %c0_73] : memref<7x8x8xf32, #tpu.memory_space<vmem>>, vector<1x8x8xf32>
    %67 = vector.shape_cast %66 : vector<1x8x8xf32> to vector<8x8xf32>
    %cst_74 = arith.constant dense<0.000000e+00> : vector<16x8xf32>
    %68 = tpu.matmul %65, %67, %cst_74 {dimension_numbers = #tpu.dot_dimension_numbers<[1], [0], [0], [1], [0, 0, 1, 1], [], []>} : vector<16x8xf32>, vector<8x8xf32>, vector<16x8xf32> -> vector<16x8xf32>
    %69 = arith.addf %63, %68 : vector<16x8xf32>
    %c0_75 = arith.constant 0 : index
    %c5 = arith.constant 5 : index
    %c0_76 = arith.constant 0 : index
    %70 = vector.load %arg13[%c0_75, %c5, %c0_76] : memref<1x22x8xf32, #tpu.memory_space<vmem>>, vector<1x16x8xf32>
    %71 = vector.shape_cast %70 : vector<1x16x8xf32> to vector<16x8xf32>
    %c5_77 = arith.constant 5 : index
    %c0_78 = arith.constant 0 : index
    %c0_79 = arith.constant 0 : index
    %72 = vector.load %arg10[%c5_77, %c0_78, %c0_79] : memref<7x8x8xf32, #tpu.memory_space<vmem>>, vector<1x8x8xf32>
    %73 = vector.shape_cast %72 : vector<1x8x8xf32> to vector<8x8xf32>
    %cst_80 = arith.constant dense<0.000000e+00> : vector<16x8xf32>
    %74 = tpu.matmul %71, %73, %cst_80 {dimension_numbers = #tpu.dot_dimension_numbers<[1], [0], [0], [1], [0, 0, 1, 1], [], []>} : vector<16x8xf32>, vector<8x8xf32>, vector<16x8xf32> -> vector<16x8xf32>
    %75 = arith.addf %69, %74 : vector<16x8xf32>
    %c0_81 = arith.constant 0 : index
    %c6 = arith.constant 6 : index
    %c0_82 = arith.constant 0 : index
    %76 = vector.load %arg13[%c0_81, %c6, %c0_82] : memref<1x22x8xf32, #tpu.memory_space<vmem>>, vector<1x16x8xf32>
    %77 = vector.shape_cast %76 : vector<1x16x8xf32> to vector<16x8xf32>
    %c6_83 = arith.constant 6 : index
    %c0_84 = arith.constant 0 : index
    %c0_85 = arith.constant 0 : index
    %78 = vector.load %arg10[%c6_83, %c0_84, %c0_85] : memref<7x8x8xf32, #tpu.memory_space<vmem>>, vector<1x8x8xf32>
    %79 = vector.shape_cast %78 : vector<1x8x8xf32> to vector<8x8xf32>
    %cst_86 = arith.constant dense<0.000000e+00> : vector<16x8xf32>
    %80 = tpu.matmul %77, %79, %cst_86 {dimension_numbers = #tpu.dot_dimension_numbers<[1], [0], [0], [1], [0, 0, 1, 1], [], []>} : vector<16x8xf32>, vector<8x8xf32>, vector<16x8xf32> -> vector<16x8xf32>
    %81 = arith.addf %75, %80 : vector<16x8xf32>
    %c0_87 = arith.constant 0 : index
    %c0_88 = arith.constant 0 : index
    %82 = vector.load %arg11[%c0_87, %c0_88] : memref<1x8xf32, #tpu.memory_space<vmem>>, vector<1x8xf32>
    %83 = vector.broadcast %82 : vector<1x8xf32> to vector<16x8xf32>
    %84 = arith.addf %81, %83 : vector<16x8xf32>
    %85 = arith.addf %10, %84 : vector<16x8xf32>
    %c0_89 = arith.constant 0 : index
    %c2_90 = arith.constant 2 : index
    %c0_91 = arith.constant 0 : index
    %86 = vector.load %arg13[%c0_89, %c2_90, %c0_91] : memref<1x22x8xf32, #tpu.memory_space<vmem>>, vector<1x16x8xf32>
    %87 = vector.shape_cast %86 : vector<1x16x8xf32> to vector<16x8xf32>
    %c0_92 = arith.constant 0 : index
    %c0_93 = arith.constant 0 : index
    %c0_94 = arith.constant 0 : index
    %88 = vector.load %arg4[%c0_92, %c0_93, %c0_94] : memref<3x8x8xf32, #tpu.memory_space<vmem>>, vector<1x8x8xf32>
    %89 = vector.shape_cast %88 : vector<1x8x8xf32> to vector<8x8xf32>
    %cst_95 = arith.constant dense<0.000000e+00> : vector<16x8xf32>
    %90 = tpu.matmul %87, %89, %cst_95 {dimension_numbers = #tpu.dot_dimension_numbers<[1], [0], [0], [1], [0, 0, 1, 1], [], []>} : vector<16x8xf32>, vector<8x8xf32>, vector<16x8xf32> -> vector<16x8xf32>
    %c0_96 = arith.constant 0 : index
    %c3_97 = arith.constant 3 : index
    %c0_98 = arith.constant 0 : index
    %91 = vector.load %arg13[%c0_96, %c3_97, %c0_98] : memref<1x22x8xf32, #tpu.memory_space<vmem>>, vector<1x16x8xf32>
    %92 = vector.shape_cast %91 : vector<1x16x8xf32> to vector<16x8xf32>
    %c1_99 = arith.constant 1 : index
    %c0_100 = arith.constant 0 : index
    %c0_101 = arith.constant 0 : index
    %93 = vector.load %arg4[%c1_99, %c0_100, %c0_101] : memref<3x8x8xf32, #tpu.memory_space<vmem>>, vector<1x8x8xf32>
    %94 = vector.shape_cast %93 : vector<1x8x8xf32> to vector<8x8xf32>
    %cst_102 = arith.constant dense<0.000000e+00> : vector<16x8xf32>
    %95 = tpu.matmul %92, %94, %cst_102 {dimension_numbers = #tpu.dot_dimension_numbers<[1], [0], [0], [1], [0, 0, 1, 1], [], []>} : vector<16x8xf32>, vector<8x8xf32>, vector<16x8xf32> -> vector<16x8xf32>
    %96 = arith.addf %90, %95 : vector<16x8xf32>
    %c0_103 = arith.constant 0 : index
    %c4_104 = arith.constant 4 : index
    %c0_105 = arith.constant 0 : index
    %97 = vector.load %arg13[%c0_103, %c4_104, %c0_105] : memref<1x22x8xf32, #tpu.memory_space<vmem>>, vector<1x16x8xf32>
    %98 = vector.shape_cast %97 : vector<1x16x8xf32> to vector<16x8xf32>
    %c2_106 = arith.constant 2 : index
    %c0_107 = arith.constant 0 : index
    %c0_108 = arith.constant 0 : index
    %99 = vector.load %arg4[%c2_106, %c0_107, %c0_108] : memref<3x8x8xf32, #tpu.memory_space<vmem>>, vector<1x8x8xf32>
    %100 = vector.shape_cast %99 : vector<1x8x8xf32> to vector<8x8xf32>
    %cst_109 = arith.constant dense<0.000000e+00> : vector<16x8xf32>
    %101 = tpu.matmul %98, %100, %cst_109 {dimension_numbers = #tpu.dot_dimension_numbers<[1], [0], [0], [1], [0, 0, 1, 1], [], []>} : vector<16x8xf32>, vector<8x8xf32>, vector<16x8xf32> -> vector<16x8xf32>
    %102 = arith.addf %96, %101 : vector<16x8xf32>
    %c0_110 = arith.constant 0 : index
    %c0_111 = arith.constant 0 : index
    %103 = vector.load %arg5[%c0_110, %c0_111] : memref<1x8xf32, #tpu.memory_space<vmem>>, vector<1x8xf32>
    %104 = vector.broadcast %103 : vector<1x8xf32> to vector<16x8xf32>
    %105 = arith.addf %102, %104 : vector<16x8xf32>
    %106 = arith.addf %105, %85 : vector<16x8xf32>
    %cst_112 = arith.constant 0.000000e+00 : f32
    %107 = vector.broadcast %cst_112 : f32 to vector<16x8xf32>
    %108 = arith.cmpf ogt, %106, %107 : vector<16x8xf32>
    %cst_113 = arith.constant 2.000000e-02 : f32
    %109 = vector.broadcast %cst_113 : f32 to vector<16x8xf32>
    %110 = arith.mulf %109, %106 : vector<16x8xf32>
    %111 = arith.select %108, %106, %110 : vector<16x8xi1>, vector<16x8xf32>
    %112 = vector.shape_cast %111 : vector<16x8xf32> to vector<1x16x8xf32>
    %c0_114 = arith.constant 0 : index
    %c3_115 = arith.constant 3 : index
    %c0_116 = arith.constant 0 : index
    %113 = vector.load %arg13[%c0_114, %c3_115, %c0_116] : memref<1x22x8xf32, #tpu.memory_space<vmem>>, vector<1x16x8xf32>
    tpu.vector_store %arg13[%c0_114, %c3_115, %c0_116], %112 {strides = array<i32>} : memref<1x22x8xf32, #tpu.memory_space<vmem>>, vector<1x16x8xf32>,
    %c0_117 = arith.constant 0 : index
    %c0_118 = arith.constant 0 : index
    %c0_119 = arith.constant 0 : index
    %114 = vector.load %arg13[%c0_117, %c0_118, %c0_119] : memref<1x22x8xf32, #tpu.memory_space<vmem>>, vector<1x16x8xf32>
    %115 = vector.shape_cast %114 : vector<1x16x8xf32> to vector<16x8xf32>
    %c0_120 = arith.constant 0 : index
    %c0_121 = arith.constant 0 : index
    %c0_122 = arith.constant 0 : index
    %116 = vector.load %arg10[%c0_120, %c0_121, %c0_122] : memref<7x8x8xf32, #tpu.memory_space<vmem>>, vector<1x8x8xf32>
    %117 = vector.shape_cast %116 : vector<1x8x8xf32> to vector<8x8xf32>
    %cst_123 = arith.constant dense<0.000000e+00> : vector<16x8xf32>
    %118 = tpu.matmul %115, %117, %cst_123 {dimension_numbers = #tpu.dot_dimension_numbers<[1], [0], [0], [1], [0, 0, 1, 1], [], []>} : vector<16x8xf32>, vector<8x8xf32>, vector<16x8xf32> -> vector<16x8xf32>
    %c0_124 = arith.constant 0 : index
    %c1_125 = arith.constant 1 : index
    %c0_126 = arith.constant 0 : index
    %119 = vector.load %arg13[%c0_124, %c1_125, %c0_126] : memref<1x22x8xf32, #tpu.memory_space<vmem>>, vector<1x16x8xf32>
    %120 = vector.shape_cast %119 : vector<1x16x8xf32> to vector<16x8xf32>
    %c1_127 = arith.constant 1 : index
    %c0_128 = arith.constant 0 : index
    %c0_129 = arith.constant 0 : index
    %121 = vector.load %arg10[%c1_127, %c0_128, %c0_129] : memref<7x8x8xf32, #tpu.memory_space<vmem>>, vector<1x8x8xf32>
    %122 = vector.shape_cast %121 : vector<1x8x8xf32> to vector<8x8xf32>
    %cst_130 = arith.constant dense<0.000000e+00> : vector<16x8xf32>
    %123 = tpu.matmul %120, %122, %cst_130 {dimension_numbers = #tpu.dot_dimension_numbers<[1], [0], [0], [1], [0, 0, 1, 1], [], []>} : vector<16x8xf32>, vector<8x8xf32>, vector<16x8xf32> -> vector<16x8xf32>
    %124 = arith.addf %118, %123 : vector<16x8xf32>
    %c0_131 = arith.constant 0 : index
    %c2_132 = arith.constant 2 : index
    %c0_133 = arith.constant 0 : index
    %125 = vector.load %arg13[%c0_131, %c2_132, %c0_133] : memref<1x22x8xf32, #tpu.memory_space<vmem>>, vector<1x16x8xf32>
    %126 = vector.shape_cast %125 : vector<1x16x8xf32> to vector<16x8xf32>
    %c2_134 = arith.constant 2 : index
    %c0_135 = arith.constant 0 : index
    %c0_136 = arith.constant 0 : index
    %127 = vector.load %arg10[%c2_134, %c0_135, %c0_136] : memref<7x8x8xf32, #tpu.memory_space<vmem>>, vector<1x8x8xf32>
    %128 = vector.shape_cast %127 : vector<1x8x8xf32> to vector<8x8xf32>
    %cst_137 = arith.constant dense<0.000000e+00> : vector<16x8xf32>
    %129 = tpu.matmul %126, %128, %cst_137 {dimension_numbers = #tpu.dot_dimension_numbers<[1], [0], [0], [1], [0, 0, 1, 1], [], []>} : vector<16x8xf32>, vector<8x8xf32>, vector<16x8xf32> -> vector<16x8xf32>
    %130 = arith.addf %124, %129 : vector<16x8xf32>
    %c0_138 = arith.constant 0 : index
    %c3_139 = arith.constant 3 : index
    %c0_140 = arith.constant 0 : index
    %131 = vector.load %arg13[%c0_138, %c3_139, %c0_140] : memref<1x22x8xf32, #tpu.memory_space<vmem>>, vector<1x16x8xf32>
    %132 = vector.shape_cast %131 : vector<1x16x8xf32> to vector<16x8xf32>
    %c3_141 = arith.constant 3 : index
    %c0_142 = arith.constant 0 : index
    %c0_143 = arith.constant 0 : index
    %133 = vector.load %arg10[%c3_141, %c0_142, %c0_143] : memref<7x8x8xf32, #tpu.memory_space<vmem>>, vector<1x8x8xf32>
    %134 = vector.shape_cast %133 : vector<1x8x8xf32> to vector<8x8xf32>
    %cst_144 = arith.constant dense<0.000000e+00> : vector<16x8xf32>
    %135 = tpu.matmul %132, %134, %cst_144 {dimension_numbers = #tpu.dot_dimension_numbers<[1], [0], [0], [1], [0, 0, 1, 1], [], []>} : vector<16x8xf32>, vector<8x8xf32>, vector<16x8xf32> -> vector<16x8xf32>
    %136 = arith.addf %130, %135 : vector<16x8xf32>
    %c0_145 = arith.constant 0 : index
    %c4_146 = arith.constant 4 : index
    %c0_147 = arith.constant 0 : index
    %137 = vector.load %arg13[%c0_145, %c4_146, %c0_147] : memref<1x22x8xf32, #tpu.memory_space<vmem>>, vector<1x16x8xf32>
    %138 = vector.shape_cast %137 : vector<1x16x8xf32> to vector<16x8xf32>
    %c4_148 = arith.constant 4 : index
    %c0_149 = arith.constant 0 : index
    %c0_150 = arith.constant 0 : index
    %139 = vector.load %arg10[%c4_148, %c0_149, %c0_150] : memref<7x8x8xf32, #tpu.memory_space<vmem>>, vector<1x8x8xf32>
    %140 = vector.shape_cast %139 : vector<1x8x8xf32> to vector<8x8xf32>
    %cst_151 = arith.constant dense<0.000000e+00> : vector<16x8xf32>
    %141 = tpu.matmul %138, %140, %cst_151 {dimension_numbers = #tpu.dot_dimension_numbers<[1], [0], [0], [1], [0, 0, 1, 1], [], []>} : vector<16x8xf32>, vector<8x8xf32>, vector<16x8xf32> -> vector<16x8xf32>
    %142 = arith.addf %136, %141 : vector<16x8xf32>
    %c0_152 = arith.constant 0 : index
    %c5_153 = arith.constant 5 : index
    %c0_154 = arith.constant 0 : index
    %143 = vector.load %arg13[%c0_152, %c5_153, %c0_154] : memref<1x22x8xf32, #tpu.memory_space<vmem>>, vector<1x16x8xf32>
    %144 = vector.shape_cast %143 : vector<1x16x8xf32> to vector<16x8xf32>
    %c5_155 = arith.constant 5 : index
    %c0_156 = arith.constant 0 : index
    %c0_157 = arith.constant 0 : index
    %145 = vector.load %arg10[%c5_155, %c0_156, %c0_157] : memref<7x8x8xf32, #tpu.memory_space<vmem>>, vector<1x8x8xf32>
    %146 = vector.shape_cast %145 : vector<1x8x8xf32> to vector<8x8xf32>
    %cst_158 = arith.constant dense<0.000000e+00> : vector<16x8xf32>
    %147 = tpu.matmul %144, %146, %cst_158 {dimension_numbers = #tpu.dot_dimension_numbers<[1], [0], [0], [1], [0, 0, 1, 1], [], []>} : vector<16x8xf32>, vector<8x8xf32>, vector<16x8xf32> -> vector<16x8xf32>
    %148 = arith.addf %142, %147 : vector<16x8xf32>
    %c0_159 = arith.constant 0 : index
    %c6_160 = arith.constant 6 : index
    %c0_161 = arith.constant 0 : index
    %149 = vector.load %arg13[%c0_159, %c6_160, %c0_161] : memref<1x22x8xf32, #tpu.memory_space<vmem>>, vector<1x16x8xf32>
    %150 = vector.shape_cast %149 : vector<1x16x8xf32> to vector<16x8xf32>
    %c6_162 = arith.constant 6 : index
    %c0_163 = arith.constant 0 : index
    %c0_164 = arith.constant 0 : index
    %151 = vector.load %arg10[%c6_162, %c0_163, %c0_164] : memref<7x8x8xf32, #tpu.memory_space<vmem>>, vector<1x8x8xf32>
    %152 = vector.shape_cast %151 : vector<1x8x8xf32> to vector<8x8xf32>
    %cst_165 = arith.constant dense<0.000000e+00> : vector<16x8xf32>
    %153 = tpu.matmul %150, %152, %cst_165 {dimension_numbers = #tpu.dot_dimension_numbers<[1], [0], [0], [1], [0, 0, 1, 1], [], []>} : vector<16x8xf32>, vector<8x8xf32>, vector<16x8xf32> -> vector<16x8xf32>
    %154 = arith.addf %148, %153 : vector<16x8xf32>
    %c0_166 = arith.constant 0 : index
    %c0_167 = arith.constant 0 : index
    %155 = vector.load %arg11[%c0_166, %c0_167] : memref<1x8xf32, #tpu.memory_space<vmem>>, vector<1x8xf32>
    %156 = vector.broadcast %155 : vector<1x8xf32> to vector<16x8xf32>
    %157 = arith.addf %154, %156 : vector<16x8xf32>
    %158 = arith.addf %85, %157 : vector<16x8xf32>
    %c0_168 = arith.constant 0 : index
    %c2_169 = arith.constant 2 : index
    %c0_170 = arith.constant 0 : index
    %159 = vector.load %arg13[%c0_168, %c2_169, %c0_170] : memref<1x22x8xf32, #tpu.memory_space<vmem>>, vector<1x16x8xf32>
    %160 = vector.shape_cast %159 : vector<1x16x8xf32> to vector<16x8xf32>
    %c0_171 = arith.constant 0 : index
    %c0_172 = arith.constant 0 : index
    %c0_173 = arith.constant 0 : index
    %161 = vector.load %arg6[%c0_171, %c0_172, %c0_173] : memref<3x8x8xf32, #tpu.memory_space<vmem>>, vector<1x8x8xf32>
    %162 = vector.shape_cast %161 : vector<1x8x8xf32> to vector<8x8xf32>
    %cst_174 = arith.constant dense<0.000000e+00> : vector<16x8xf32>
    %163 = tpu.matmul %160, %162, %cst_174 {dimension_numbers = #tpu.dot_dimension_numbers<[1], [0], [0], [1], [0, 0, 1, 1], [], []>} : vector<16x8xf32>, vector<8x8xf32>, vector<16x8xf32> -> vector<16x8xf32>
    %c0_175 = arith.constant 0 : index
    %c3_176 = arith.constant 3 : index
    %c0_177 = arith.constant 0 : index
    %164 = vector.load %arg13[%c0_175, %c3_176, %c0_177] : memref<1x22x8xf32, #tpu.memory_space<vmem>>, vector<1x16x8xf32>
    %165 = vector.shape_cast %164 : vector<1x16x8xf32> to vector<16x8xf32>
    %c1_178 = arith.constant 1 : index
    %c0_179 = arith.constant 0 : index
    %c0_180 = arith.constant 0 : index
    %166 = vector.load %arg6[%c1_178, %c0_179, %c0_180] : memref<3x8x8xf32, #tpu.memory_space<vmem>>, vector<1x8x8xf32>
    %167 = vector.shape_cast %166 : vector<1x8x8xf32> to vector<8x8xf32>
    %cst_181 = arith.constant dense<0.000000e+00> : vector<16x8xf32>
    %168 = tpu.matmul %165, %167, %cst_181 {dimension_numbers = #tpu.dot_dimension_numbers<[1], [0], [0], [1], [0, 0, 1, 1], [], []>} : vector<16x8xf32>, vector<8x8xf32>, vector<16x8xf32> -> vector<16x8xf32>
    %169 = arith.addf %163, %168 : vector<16x8xf32>
    %c0_182 = arith.constant 0 : index
    %c4_183 = arith.constant 4 : index
    %c0_184 = arith.constant 0 : index
    %170 = vector.load %arg13[%c0_182, %c4_183, %c0_184] : memref<1x22x8xf32, #tpu.memory_space<vmem>>, vector<1x16x8xf32>
    %171 = vector.shape_cast %170 : vector<1x16x8xf32> to vector<16x8xf32>
    %c2_185 = arith.constant 2 : index
    %c0_186 = arith.constant 0 : index
    %c0_187 = arith.constant 0 : index
    %172 = vector.load %arg6[%c2_185, %c0_186, %c0_187] : memref<3x8x8xf32, #tpu.memory_space<vmem>>, vector<1x8x8xf32>
    %173 = vector.shape_cast %172 : vector<1x8x8xf32> to vector<8x8xf32>
    %cst_188 = arith.constant dense<0.000000e+00> : vector<16x8xf32>
    %174 = tpu.matmul %171, %173, %cst_188 {dimension_numbers = #tpu.dot_dimension_numbers<[1], [0], [0], [1], [0, 0, 1, 1], [], []>} : vector<16x8xf32>, vector<8x8xf32>, vector<16x8xf32> -> vector<16x8xf32>
    %175 = arith.addf %169, %174 : vector<16x8xf32>
    %c0_189 = arith.constant 0 : index
    %c0_190 = arith.constant 0 : index
    %176 = vector.load %arg7[%c0_189, %c0_190] : memref<1x8xf32, #tpu.memory_space<vmem>>, vector<1x8xf32>
    %177 = vector.broadcast %176 : vector<1x8xf32> to vector<16x8xf32>
    %178 = arith.addf %175, %177 : vector<16x8xf32>
    %179 = arith.addf %178, %158 : vector<16x8xf32>
    %cst_191 = arith.constant 0.000000e+00 : f32
    %180 = vector.broadcast %cst_191 : f32 to vector<16x8xf32>
    %181 = arith.cmpf ogt, %179, %180 : vector<16x8xf32>
    %cst_192 = arith.constant 2.000000e-02 : f32
    %182 = vector.broadcast %cst_192 : f32 to vector<16x8xf32>
    %183 = arith.mulf %182, %179 : vector<16x8xf32>
    %184 = arith.select %181, %179, %183 : vector<16x8xi1>, vector<16x8xf32>
    %185 = vector.shape_cast %184 : vector<16x8xf32> to vector<1x16x8xf32>
    %c0_193 = arith.constant 0 : index
    %c0_194 = arith.constant 0 : index
    %c0_195 = arith.constant 0 : index
    %186 = vector.load %arg12[%c0_193, %c0_194, %c0_195] : memref<1x16x8xf32, #tpu.memory_space<vmem>>, vector<1x16x8xf32>
    tpu.vector_store %arg12[%c0_193, %c0_194, %c0_195], %185 {strides = array<i32>} : memref<1x16x8xf32, #tpu.memory_space<vmem>>, vector<1x16x8xf32>,
    return
  }
  func.func @transform_0(%arg0: i32) -> (i32, i32, i32) {
    %c0_i32 = arith.constant 0 : i32
    %c0_i32_0 = arith.constant 0 : i32
    %c0_i32_1 = arith.constant 0 : i32
    return %arg0, %c0_i32, %c0_i32_0 : i32, i32, i32
  }
  func.func @transform_1(%arg0: i32) -> (i32, i32, i32) {
    %c0_i32 = arith.constant 0 : i32
    %c0_i32_0 = arith.constant 0 : i32
    %c0_i32_1 = arith.constant 0 : i32
    %c0_i32_2 = arith.constant 0 : i32
    return %c0_i32, %c0_i32_0, %c0_i32_1 : i32, i32, i32
  }
  func.func @transform_2(%arg0: i32) -> (i32, i32) {
    %c0_i32 = arith.constant 0 : i32
    %c0_i32_0 = arith.constant 0 : i32
    %c0_i32_1 = arith.constant 0 : i32
    return %c0_i32, %c0_i32_0 : i32, i32
  }
  func.func @transform_3(%arg0: i32) -> (i32, i32, i32) {
    %c0_i32 = arith.constant 0 : i32
    %c0_i32_0 = arith.constant 0 : i32
    %c0_i32_1 = arith.constant 0 : i32
    %c0_i32_2 = arith.constant 0 : i32
    return %c0_i32, %c0_i32_0, %c0_i32_1 : i32, i32, i32
  }
  func.func @transform_4(%arg0: i32) -> (i32, i32) {
    %c0_i32 = arith.constant 0 : i32
    %c0_i32_0 = arith.constant 0 : i32
    %c0_i32_1 = arith.constant 0 : i32
    return %c0_i32, %c0_i32_0 : i32, i32
  }
  func.func @transform_5(%arg0: i32) -> (i32, i32, i32) {
    %c0_i32 = arith.constant 0 : i32
    %c0_i32_0 = arith.constant 0 : i32
    %c0_i32_1 = arith.constant 0 : i32
    %c0_i32_2 = arith.constant 0 : i32
    return %c0_i32, %c0_i32_0, %c0_i32_1 : i32, i32, i32
  }
  func.func @transform_6(%arg0: i32) -> (i32, i32) {
    %c0_i32 = arith.constant 0 : i32
    %c0_i32_0 = arith.constant 0 : i32
    %c0_i32_1 = arith.constant 0 : i32
    return %c0_i32, %c0_i32_0 : i32, i32
  }
  func.func @transform_7(%arg0: i32) -> (i32, i32, i32) {
    %c0_i32 = arith.constant 0 : i32
    %c0_i32_0 = arith.constant 0 : i32
    %c0_i32_1 = arith.constant 0 : i32
    %c0_i32_2 = arith.constant 0 : i32
    return %c0_i32, %c0_i32_0, %c0_i32_1 : i32, i32, i32
  }
  func.func @transform_8(%arg0: i32) -> (i32, i32) {
    %c0_i32 = arith.constant 0 : i32
    %c0_i32_0 = arith.constant 0 : i32
    %c0_i32_1 = arith.constant 0 : i32
    return %c0_i32, %c0_i32_0 : i32, i32
  }
  func.func @transform_9(%arg0: i32) -> (i32, i32, i32) {
    %c0_i32 = arith.constant 0 : i32
    %c0_i32_0 = arith.constant 0 : i32
    %c0_i32_1 = arith.constant 0 : i32
    %c0_i32_2 = arith.constant 0 : i32
    return %c0_i32, %c0_i32_0, %c0_i32_1 : i32, i32, i32
  }
  func.func @transform_10(%arg0: i32) -> (i32, i32) {
    %c0_i32 = arith.constant 0 : i32
    %c0_i32_0 = arith.constant 0 : i32
    %c0_i32_1 = arith.constant 0 : i32
    return %c0_i32, %c0_i32_0 : i32, i32
  }
  func.func @transform_11(%arg0: i32) -> (i32, i32, i32) {
    %c0_i32 = arith.constant 0 : i32
    %c0_i32_0 = arith.constant 0 : i32
    %c0_i32_1 = arith.constant 0 : i32
    return %arg0, %c0_i32, %c0_i32_0 : i32, i32, i32
  }
}

</mosaic_0001>

<bundles_post_ra>
// kernel: tpu_custom_call.1
= control target key start
LH: loop header
LB: loop body
LE: loop exit
PB: predicated region body
PF: predicated region fallthrough
CT: control target
= control target key end

     0   :  { %16 = vsyncpa [#allocation4], 0  ;;  %s3544_s0 = inlined_call_operand.vmem [shape: f32[2,16,4], index: 0, kind: input, shape index: {}]   ;;  %s3545_s1 = inlined_call_operand.vmem [shape: f32[3,4,8], index: 1, kind: input, shape index: {}]   ;;  %s3546_s2 = inlined_call_operand.vmem [shape: f32[1,8], index: 2, kind: input, shape index: {}]   ;;  %s3547_s3 = inlined_call_operand.hbm [shape: f32[3,8,8], index: 3, kind: input, shape index: {}]   ;;  %s3548_s4 = inlined_call_operand.vmem [shape: f32[1,8], index: 4, kind: input, shape index: {}]   ;;  %s3549_s5 = inlined_call_operand.hbm [shape: f32[3,8,8], index: 5, kind: input, shape index: {}]   ;;  %s3550_s6 = inlined_call_operand.hbm [shape: f32[1,8], index: 6, kind: input, shape index: {}]   ;;  %s3551_s7 = inlined_call_operand.vmem [shape: f32[1,4,8], index: 7, kind: input, shape index: {}]   ;;  %s3552_s8 = inlined_call_operand.hbm [shape: f32[1,8], index: 8, kind: input, shape index: {}]   ;;  %s3553_s9 = inlined_call_operand.vmem [shape: f32[7,8,8], index: 9, kind: input, shape index: {}]   ;;  %s3554_s10 = inlined_call_operand.vmem [shape: f32[1,8], index: 10, kind: input, shape index: {}]   ;;  %s3555_s11 = inlined_call_operand.vmem [shape: f32[2,16,8], index: 11, kind: output, shape index: {}]  }
   0x1   :  { %17 = vsyncpa [#allocation6], 0 }
   0x2   :  { %18 = vsyncpa [#allocation9], 0  ;;  %s3230_s17 = smov 0  }
   0x3 LB: > { %3559 = sst [smem:[#allocation13_spill]] %s3161_s17  ;;  %s3236_s18 = sadd.s32 4294967295, %s3161_s17   ;;  %s3161_s17 = sphi %s3230_s17, %s24_s17  }
   0x4   : > { %p2652_p0 = scmp.ge.s32.totalorder %s3161_s17, 1  ;;  %p291_p1 = scmp.lt.s32.totalorder %s3161_s17, 3 }
   0x5   : > { %p3557_p2 = scmp.eq.s32.totalorder %s3236_s18, 0  ;;  %s3163_s20 = smov [#allocation5]  }
   0x6   : > { %p3241_p3 = pnand %p2652_p0, %p291_p1  ;;  %s325_s21 = sshll.u32 %s3163_s20, 4  ;;  %s3245_s21 = int_to_ptr.vmem [resolvable:$true] %s325_s21 }
   0x7   : > { %s3164_s22 = smov [#allocation3]   ;;  %s3165_s25 = smov [#allocation7]  }
   0x8   : > { %s3560_s19 = scalar_select %p3241_p3, 1, 0 }
   0x9   : > { %p2995_p4 = pneg %p3241_p3  ;;  %s309_s23 = sshll.u32 %s3164_s22, 4  ;;  %s3249_s23 = int_to_ptr.vmem [resolvable:$true] %s309_s23 }
   0xa   : > { %s339_s26 = sshll.u32 %s3165_s25, 4  ;;  %s3166_s27 = smov [#allocation8]   ;;  %s3257_s26 = int_to_ptr.vmem [resolvable:$true] %s339_s26 }
   0xb   : > { %p3253_p5 = pnand %p3557_p2, %p2995_p4  ;;  %s3259_s28 = sshll.u32 %s3166_s27, 4  ;;  %s354_s28 = int_to_ptr.vmem [resolvable:$true] %s3259_s28 }
   0xc   : > { %s3031_s12 = scalar_lea.hbm %s3549_s5, 384 }
   0xd   : > { %p3032_p6 = scmp.ne.s32.totalorder %s3549_s5, %s3031_s12  ;;  %p3269_p7 = pneg %p3253_p5 }
   0xe   : > { %p3038_p10 = scmp.lt.u32.totalorder %s3031_s12, %s3549_s5 }
   0xf   : > { %p3034_p8 = pnand %p3269_p7, %p3032_p6 }
  0x11   : > { %p3035_p9 = pneg %p3034_p8 }
  0x13   : > { %p3040_p11 = pnand %p3038_p10, %p3035_p9 }
  0x15   : > { %3043 = shalt.err (!%p3040_p11)
}
  0x16   : > { %s3044_s22 = scalar_lea.vmem %s3245_s21, 384  ;;  %p3052_p1 = scmp.lt.s32.totalorder %s3245_s21, %s3245_s21 }
  0x17   : > { %p3045_p12 = scmp.ne.s32.totalorder %s3245_s21, %s3044_s22  ;;  %p3053_p4 = scmp.lt.s32.totalorder %s3044_s22, %s3044_s22 }
  0x19   : > { %p3047_p13 = pnand %p3045_p12, %p3269_p7  ;;  %p3054_p6 = por %p3053_p4, %p3052_p1 }
  0x1b   : > { %p3048_p0 = pneg %p3047_p13 }
  0x1d   : > { %p3055_p8 = pnand %p3054_p6, %p3048_p0 }
  0x1f   : > { %3058 = shalt.err (!%p3055_p8)
}
  0x20   : > { %s3167_s25 = smov 128   ;;  %s3168_s27 = smov 8  }
  0x21   : > { %3001 = dma.hbm_to_vmem [thread:$0]  (!%p3253_p5), %s3549_s5, 384, %s3245_s21, [#allocation6], %s3167_s25, %s3167_s25, %s3168_s27  }
  0x22   : > { %s3059_s14 = scalar_lea.hbm %s3547_s3, 384 }
  0x23   : > { %p3060_p9 = scmp.ne.s32.totalorder %s3547_s3, %s3059_s14  ;;  %p3066_p12 = scmp.lt.u32.totalorder %s3059_s14, %s3547_s3 }
  0x25   : > { %p3062_p10 = pnand %p3060_p9, %p3269_p7 }
  0x27   : > { %p3063_p11 = pneg %p3062_p10 }
  0x29   : > { %p3068_p13 = pnand %p3066_p12, %p3063_p11 }
  0x2b   : > { %3071 = shalt.err (!%p3068_p13)
}
  0x2c   : > { %s3072_s21 = scalar_lea.vmem %s3249_s23, 384  ;;  %p3080_p6 = scmp.lt.s32.totalorder %s3249_s23, %s3249_s23 }
  0x2d   : > { %p3073_p0 = scmp.ne.s32.totalorder %s3249_s23, %s3072_s21  ;;  %p3081_p8 = scmp.lt.s32.totalorder %s3072_s21, %s3072_s21 }
  0x2f   : > { %p3075_p1 = pnand %p3073_p0, %p3269_p7  ;;  %p3082_p9 = por %p3081_p8, %p3080_p6 }
  0x31   : > { %p3076_p4 = pneg %p3075_p1 }
  0x33   : > { %p3083_p10 = pnand %p3082_p9, %p3076_p4 }
  0x35   : > { %3086 = shalt.err (!%p3083_p10)
}
  0x36   : > { %2998 = dma.hbm_to_vmem [thread:$0]  (!%p3253_p5), %s3547_s3, 384, %s3249_s23, [#allocation4], %s3167_s25, %s3167_s25, %s3168_s27  }
  0x37   : > { %s3087_s13 = scalar_lea.hbm %s3550_s6, 16 }
  0x38   : > { %p3088_p11 = scmp.ne.s32.totalorder %s3550_s6, %s3087_s13  ;;  %p3094_p0 = scmp.lt.u32.totalorder %s3087_s13, %s3550_s6 }
  0x3a   : > { %p3090_p12 = pnand %p3088_p11, %p3269_p7 }
  0x3c   : > { %p3091_p13 = pneg %p3090_p12 }
  0x3e   : > { %p3096_p1 = pnand %p3094_p0, %p3091_p13 }
  0x40   : > { %3099 = shalt.err (!%p3096_p1)
}
  0x41   : > { %s3100_s23 = scalar_lea.vmem %s3257_s26, 16  ;;  %s3107_s25 = scalar_lea.vmem %s3257_s26, 32 }
  0x42   : > { %p3101_p4 = scmp.ne.s32.totalorder %s3257_s26, %s3100_s23  ;;  %p3108_p9 = scmp.lt.s32.totalorder %s3257_s26, %s3257_s26 }
  0x43   : > { %p3109_p10 = scmp.lt.s32.totalorder %s3107_s25, %s3100_s23 }
  0x44   : > { %p3103_p6 = pnand %p3101_p4, %p3269_p7 }
  0x45   : > { %p3110_p11 = por %p3109_p10, %p3108_p9 }
  0x46   : > { %p3104_p8 = pneg %p3103_p6 }
  0x48   : > { %p3111_p12 = pnand %p3110_p11, %p3104_p8 }
  0x4a   : > { %3114 = shalt.err (!%p3111_p12)
}
  0x4b   : > { %3004 = dma.hbm_to_vmem [thread:$0]  (!%p3253_p5), %s3550_s6, 16, %s3257_s26, [#allocation6]  }
  0x4c   : > { %s3115_s30 = scalar_lea.hbm %s3552_s8, 16 }
  0x4d   : > { %p3116_p13 = scmp.ne.s32.totalorder %s3552_s8, %s3115_s30  ;;  %p3122_p4 = scmp.lt.u32.totalorder %s3115_s30, %s3552_s8 }
  0x4f   : > { %p3118_p0 = pnand %p3116_p13, %p3269_p7 }
  0x51   : > { %p3119_p1 = pneg %p3118_p0 }
  0x53   : > { %p3124_p6 = pnand %p3122_p4, %p3119_p1 }
  0x55   : > { %3127 = shalt.err (!%p3124_p6)
}
  0x56   : > { %s3128_s20 = scalar_lea.vmem %s354_s28, 16  ;;  %s3135_s26 = scalar_lea.vmem %s354_s28, 32 }
  0x57   : > { %p3129_p8 = scmp.ne.s32.totalorder %s354_s28, %s3128_s20  ;;  %p3136_p11 = scmp.lt.s32.totalorder %s354_s28, %s354_s28 }
  0x58   : > { %p3137_p12 = scmp.lt.s32.totalorder %s3135_s26, %s3128_s20 }
  0x59   : > { %p3131_p9 = pnand %p3129_p8, %p3269_p7 }
  0x5a   : > { %p3138_p2 = por %p3137_p12, %p3136_p11 }
  0x5b   : > { %p3132_p10 = pneg %p3131_p9 }
  0x5d   : > { %p3139_p3 = pnand %p3138_p2, %p3132_p10 }
  0x5f   : > { %3142 = shalt.err (!%p3139_p3)
}
  0x60   : > { %3007 = dma.hbm_to_vmem [thread:$0]  (!%p3253_p5), %s3552_s8, 16, %s354_s28, [#allocation9]  }
  0x61   : > { %p3563_p13 = scmp.ne.s32.totalorder %s3560_s19, 0 }
  0x62   : > { %p3564_p0 = scmp.eq.s32.totalorder (!%p3563_p13), %s3236_s18, 0 }
  0x63   : > { %380 = sbr.rel (%p3563_p13) target bundleno = 949 (0x3b5), region = 64 }
  0x6a   : > { %3148 = dma.done.wait (%p3564_p0), [#allocation4], 384   ;;  %p3565_p7 = pmov %p3564_p0 }
  0x6b   : > { %p3566_p1 = pmov %p3564_p0 }
  0x6c   : > { %3150 = vsyncadd (%p3565_p7), [#allocation4], 4294966912 }
  0x6d   : > { %3152 = dma.done.wait (%p3566_p1), [#allocation6], 400   ;;  %p3567_p2 = pmov %p3564_p0 }
  0x6e   : > { %p3568_p3 = pmov %p3564_p0 }
  0x6f   : > { %3154 = vsyncadd (%p3567_p2), [#allocation6], 4294966896 }
  0x70   : > { %3156 = dma.done.wait (%p3568_p3), [#allocation9], 16   ;;  %p3569_p5 = pmov %p3564_p0 }
  0x71   : > { %p432_p4 = scmp.lt.s32.totalorder %s3236_s18, 1  ;;  %vm442_vm0 = vcmask 59392   ;;  %v3169_v0 = vmov 0.0   ;;  %vm462_vm1 = vcmask 1043456   ;;  %vm455_vm2 = vcmask 31744   ;;  %v2683_v13 = vld [vmem:[%s3553_s9 + $0x8] sm:$0xff] }
  0x72   : > { %3158 = vsyncadd (%p3569_p5), [#allocation9], 4294967280  ;;  %443 = vst.msk [vmem:[#allocation2] sm:$0x7] %vm442_vm0, %v3169_v0  ;;  %v447_v1 = vld [vmem:[%s3551_s7] sm:$0xf] }
  0x73   : > { %s3572_s18 = smov (!%p432_p4, %s3236_s18), 1  ;;  %444 = vst.msk [vmem:[#allocation2 + $0x13] sm:$0x7] %vm442_vm0, %v3169_v0  ;;  %2815 = vmatprep.subr.msk.mxu0 %vm462_vm1, %v447_v1  ;;  %v2671_v4 = vld [vmem:[%s3545_s1 + $0x4] sm:$0xf]  ;;  %v1443_v14 = vld [vmem:[#allocation3] sm:$0xff] }
  0x74   : > { %s2741_s19 = sshll.u32 %s3572_s18, 4  ;;  %2816 = vmatpush3.msk.msra.mxu0 %vm462_vm1, %v447_v1  ;;  %v545_v5 = vld [vmem:[%s3545_s1] sm:$0xf]  ;;  %v2678_v9 = vld [vmem:[%s3545_s1 + $0x8] sm:$0xf]  ;;  %2875 = vmatprep.subr.mxu1 %v1443_v14  ;;  %vm825_vm4 = vcmask 64512  }
  0x75   : > { %s436_s15 = scalar_lea.vmem %s3544_s0, %s2741_s19  ;;  %2820 = vmatprep.subr.msk.mxu0 %vm462_vm1, %v2671_v4  ;;  %2876 = vmatpush3.msra.mxu1 %v1443_v14  ;;  %v3416_v15 = vld [vmem:[%s3553_s9] sm:$0xff]  ;;  %v3435_v37 = vld [vmem:[%s3553_s9 + $0x10] sm:$0xff]  ;;  %v3446_v42 = vld [vmem:[%s3553_s9 + $0x18] sm:$0xff]  ;;  %s441_s23 = scalar_lea.vmem %s3555_s11, %s2741_s19 }
  0x76   : > { %v445_v2 = vld [vmem:[%s436_s15] sm:$0xff]  ;;  %v446_v3 = vld [vmem:[%s436_s15 + $0x8] sm:$0xff]  ;;  %v3475_v47 = vld [vmem:[%s3553_s9 + $0x30] sm:$0xff] }
  0x77   : > { %2817 = vmatprep.mubr.msk.f32.mxu0 %vm455_vm2, %v445_v2  ;;  %541 = vst.msk [vmem:[#allocation2 + $0x3] sm:$0xff] %vm455_vm2, %v445_v2  ;;  %542 = vst.msk [vmem:[#allocation2 + $0xb] sm:$0xff] %vm455_vm2, %v446_v3  ;;  %v1597_v16 = vld [vmem:[#allocation3 + $0x10] sm:$0xff]  ;;  %v3466_v46 = vld [vmem:[%s3553_s9 + $0x28] sm:$0xff] }
  0x78   : > { %2818 = vmatmul.mubr.msk.f32.vlgmr.msra.gmra.mrb[0].mxu0 %vm455_vm2, %v446_v3  ;;  %2880 = vmatprep.subr.mxu1 %v1597_v16  ;;  %v2667_v19 = vld [vmem:[#allocation8] ss:$0 sm:$0xff]  ;;  %v2682_v20 = vld [vmem:[%s3546_s2] ss:$0 sm:$0xff]  ;;  %v1445_v50 = vld [vmem:[#allocation3 + $0x8] sm:$0xff] }
  0x79   : > { %2821 = vmatpush3.msk.msra.mxu0 %vm462_vm1, %v2671_v4  ;;  %v3457_v43 = vld [vmem:[%s3553_s9 + $0x20] sm:$0xff] }
  0x7a   : > { %2825 = vmatprep.subr.msk.mxu0 %vm462_vm1, %v545_v5  ;;  %v2703_v55 = vld [vmem:[%s3554_s10] ss:$0 sm:$0xff] }
  0x7b   : > { %v2710_v63 = vld [vmem:[%s3548_s4] ss:$0 sm:$0xff] }
  0x7e   : > { %v546_v6 = vld [vmem:[#allocation2 + $0x3] sm:$0xff]  ;;  %v547_v7 = vld [vmem:[#allocation2 + $0xb] sm:$0xff] }
  0x7f   : > { %v543_v8 = vld [vmem:[#allocation2 + $0x2] sm:$0xff]  ;;  %2822 = vmatprep.mubr.msk.f32.mxu0 %vm455_vm2, %v546_v6  ;;  %v544_v10 = vld [vmem:[#allocation2 + $0xa] sm:$0xff] }
  0x80   : > { %2823 = vmatmul.mubr.msk.f32.vlgmr.msra.gmra.mrb[2].mxu0 %vm455_vm2, %v547_v7  ;;  %v718_v11 = vld [vmem:[#allocation2 + $0x4] sm:$0xff]  ;;  %v719_v12 = vld [vmem:[#allocation2 + $0xc] sm:$0xff] }
  0x81   : > { %2826 = vmatpush3.msk.msra.mxu0 %vm462_vm1, %v545_v5  ;;  %2827 = vmatprep.mubr.msk.f32.mxu0 %vm455_vm2, %v543_v8 }
  0x82   : > { %2830 = vmatprep.subr.msk.mxu0 %vm462_vm1, %v2678_v9 }
  0x88   : > { %2828 = vmatmul.mubr.msk.f32.vlgmr.msra.gmra.mrb[2].mxu0 %vm455_vm2, %v544_v10 }
  0x89   : > { %2831 = vmatpush3.msk.msra.mxu0 %vm462_vm1, %v2678_v9  ;;  %2832 = vmatprep.mubr.msk.f32.mxu0 %vm455_vm2, %v718_v11 }
  0x8a   : > { %2835 = vmatprep.subr.mxu0 %v2683_v13 }
  0x90   : > { %2833 = vmatmul.mubr.msk.f32.vlgmr.msra.gmra.mrb[2].mxu0 %vm455_vm2, %v719_v12 }
  0x91   : > { %2836 = vmatpush3.msra.mxu0 %v2683_v13 }
  0x92   : > { %2840 = vmatprep.subr.mxu0 %v3416_v15 }
 0x14b   : > { %v2819_v17 = vpop.f32.mrb[0].mxu0 }
 0x14c   : > { %v532_v18 = vpop.f32.mrb[1].mxu0  ;;  %v3422_v22 = vadd.f32 %v2819_v17, %v2667_v19 }
 0x14d   : > { %v3424_v25 = vadd.f32 %v2667_v19, %v532_v18 }
 0x163   : > { %v2834_v21 = vpop.f32.mrb[2].mxu0 }
 0x164   : > { %v816_v23 = vadd.f32 %v2834_v21, %v2682_v20  ;;  %v797_v24 = vpop.f32.mrb[3].mxu0 }
 0x165   : > { %v815_v26 = vadd.f32 %v2682_v20, %v797_v24 }
 0x166   : > { %v818_v27 = vadd.f32 %v816_v23, %v3422_v22 }
 0x167   : > { %v817_v28 = vadd.f32 %v815_v26, %v3424_v25 }
 0x168   : > { %vm820_vm3 = vcmp.gt.f32.partialorder %v818_v27, 0.0  ;;  %v822_v29 = vmul.f32 0.02, %v818_v27 }
 0x169   : > { %vm819_vm5 = vcmp.gt.f32.partialorder %v817_v28, 0.0  ;;  %v821_v30 = vmul.f32 0.02, %v817_v28 }
 0x16a   : > { %v824_v31 = vsel %vm820_vm3, %v818_v27, %v822_v29  ;;  %v2457_v29 = vld [vmem:[#allocation5 + $0x10] sm:$0xff] }
 0x16b   : > { %827 = vst.msk [vmem:[#allocation2 + $0xb] sm:$0xff] %vm825_vm4, %v824_v31  ;;  %v823_v32 = vsel %vm819_vm5, %v817_v28, %v821_v30  ;;  %v2303_v28 = vld [vmem:[#allocation5] sm:$0xff]  ;;  %v2738_v31 = vld [vmem:[#allocation7] ss:$0 sm:$0xff] }
 0x16c   : > { %826 = vst.msk [vmem:[#allocation2 + $0x3] sm:$0xff] %vm825_vm4, %v823_v32 }
 0x172   : > { %v1172_v41 = vld [vmem:[#allocation2 + $0xc] sm:$0xff] }
 0x173   : > { %v831_v33 = vld [vmem:[#allocation2 + $0x1] sm:$0xff]  ;;  %v832_v35 = vld [vmem:[#allocation2 + $0x9] sm:$0xff] }
 0x174   : > { %v997_v34 = vld [vmem:[#allocation2 + $0x2] sm:$0xff]  ;;  %2837 = vmatprep.mubr.msk.f32.mxu0 %vm825_vm4, %v831_v33  ;;  %v998_v36 = vld [vmem:[#allocation2 + $0xa] sm:$0xff] }
 0x175   : > { %2877 = vmatprep.mubr.msk.f32.mxu1 %vm825_vm4, %v997_v34  ;;  %2838 = vmatmul.mubr.msk.f32.vlgmr.msra.gmra.mrb[4].mxu0 %vm825_vm4, %v832_v35  ;;  %v828_v38 = vld [vmem:[#allocation2] sm:$0xff]  ;;  %v829_v40 = vld [vmem:[#allocation2 + $0x8] sm:$0xff] }
 0x176   : > { %2878 = vmatmul.mubr.msk.f32.vlgmr.msra.gmra.mrb[0].mxu1 %vm825_vm4, %v998_v36  ;;  %2841 = vmatpush3.msra.mxu0 %v3416_v15  ;;  %v1171_v39 = vld [vmem:[#allocation2 + $0x4] sm:$0xff]  ;;  %v1259_v49 = vld [vmem:[#allocation2 + $0xd] sm:$0xff] }
 0x177   : > { %2842 = vmatprep.mubr.msk.f32.mxu0 %vm825_vm4, %v828_v38  ;;  %2882 = vmatprep.mubr.msk.f32.mxu1 %vm825_vm4, %v1171_v39  ;;  %v1084_v44 = vld [vmem:[#allocation2 + $0x3] sm:$0xff]  ;;  %v1085_v45 = vld [vmem:[#allocation2 + $0xb] sm:$0xff] }
 0x178   : > { %2845 = vmatprep.subr.mxu0 %v3435_v37  ;;  %2881 = vmatpush3.msra.mxu1 %v1597_v16  ;;  %v1258_v48 = vld [vmem:[#allocation2 + $0x5] sm:$0xff]  ;;  %v1346_v52 = vld [vmem:[#allocation2 + $0xe] sm:$0xff] }
 0x179   : > { %2885 = vmatprep.subr.mxu1 %v2683_v13  ;;  %v1345_v51 = vld [vmem:[#allocation2 + $0x6] sm:$0xff] }
 0x17d   : > { %2843 = vmatmul.mubr.msk.f32.vlgmr.msra.gmra.mrb[4].mxu0 %vm825_vm4, %v829_v40 }
 0x17e   : > { %2883 = vmatmul.mubr.msk.f32.vlgmr.msra.gmra.mrb[0].mxu1 %vm825_vm4, %v1172_v41  ;;  %2846 = vmatpush3.msra.mxu0 %v3435_v37 }
 0x17f   : > { %2847 = vmatprep.mubr.msk.f32.mxu0 %vm825_vm4, %v997_v34  ;;  %2850 = vmatprep.subr.mxu0 %v3446_v42 }
 0x180   : > { %2886 = vmatpush3.msra.mxu1 %v2683_v13 }
 0x181   : > { %2890 = vmatprep.subr.mxu1 %v3416_v15 }
 0x185   : > { %2848 = vmatmul.mubr.msk.f32.vlgmr.msra.gmra.mrb[4].mxu0 %vm825_vm4, %v998_v36 }
 0x186   : > { %2851 = vmatpush3.msra.mxu0 %v3446_v42  ;;  %2852 = vmatprep.mubr.msk.f32.mxu0 %vm825_vm4, %v1084_v44 }
 0x187   : > { %2855 = vmatprep.subr.mxu0 %v3457_v43 }
 0x18d   : > { %2853 = vmatmul.mubr.msk.f32.vlgmr.msra.gmra.mrb[4].mxu0 %vm825_vm4, %v1085_v45 }
 0x18e   : > { %2856 = vmatpush3.msra.mxu0 %v3457_v43  ;;  %2857 = vmatprep.mubr.msk.f32.mxu0 %vm825_vm4, %v1171_v39 }
 0x18f   : > { %2860 = vmatprep.subr.mxu0 %v3466_v46 }
 0x195   : > { %2858 = vmatmul.mubr.msk.f32.vlgmr.msra.gmra.mrb[4].mxu0 %vm825_vm4, %v1172_v41 }
 0x196   : > { %2861 = vmatpush3.msra.mxu0 %v3466_v46  ;;  %2862 = vmatprep.mubr.msk.f32.mxu0 %vm825_vm4, %v1258_v48 }
 0x197   : > { %2865 = vmatprep.subr.mxu0 %v3475_v47 }
 0x19d   : > { %2863 = vmatmul.mubr.msk.f32.vlgmr.msra.gmra.mrb[4].mxu0 %vm825_vm4, %v1259_v49 }
 0x19e   : > { %2866 = vmatpush3.msra.mxu0 %v3475_v47  ;;  %2867 = vmatprep.mubr.msk.f32.mxu0 %vm825_vm4, %v1345_v51 }
 0x19f   : > { %2870 = vmatprep.subr.mxu0 %v1445_v50 }
 0x1a5   : > { %2868 = vmatmul.mubr.msk.f32.vlgmr.msra.gmra.mrb[4].mxu0 %vm825_vm4, %v1346_v52 }
 0x1a6   : > { %2871 = vmatpush3.msra.mxu0 %v1445_v50  ;;  %2872 = vmatprep.mubr.msk.f32.mxu0 %vm825_vm4, %v1084_v44 }
 0x1a9   : > { %2873 = vmatmul.mubr.msk.f32.vlgmr.msra.gmra.mrb[6].mxu0 %vm825_vm4, %v1085_v45 }
 0x251   : > { %v2884_v53 = vpop.f32.mrb[0].mxu1 }
 0x252   : > { %v1664_v54 = vpop.f32.mrb[1].mxu1 }
 0x278   : > { %v2869_v56 = vpop.f32.mrb[4].mxu0 }
 0x279   : > { %v1440_v57 = vadd.f32 %v2869_v56, %v2703_v55  ;;  %v1421_v58 = vpop.f32.mrb[5].mxu0 }
 0x27a   : > { %v1439_v59 = vadd.f32 %v2703_v55, %v1421_v58 }
 0x27b   : > { %v1442_v60 = vadd.f32 %v1440_v57, %v3422_v22 }
 0x27c   : > { %v1441_v61 = vadd.f32 %v1439_v59, %v3424_v25  ;;  %v2874_v62 = vpop.f32.mrb[6].mxu0  ;;  %v2305_v25 = vld [vmem:[#allocation5 + $0x8] sm:$0xff] }
 0x27d   : > { %v2935_v0 = vadd.f32 %v2884_v53, %v2874_v62  ;;  %v1512_v1 = vpop.f32.mrb[7].mxu0  ;;  %v3495_v2 = vadd.f32 %v2703_v55, %v1442_v60 }
 0x27e   : > { %v2936_v3 = vadd.f32 %v1664_v54, %v1512_v1  ;;  %v3497_v4 = vadd.f32 %v2703_v55, %v1441_v61 }
 0x27f   : > { %v1683_v5 = vadd.f32 %v2935_v0, %v2710_v63 }
 0x280   : > { %v1682_v6 = vadd.f32 %v2936_v3, %v2710_v63 }
 0x281   : > { %v1685_v7 = vadd.f32 %v1683_v5, %v1442_v60 }
 0x282   : > { %v1684_v8 = vadd.f32 %v1682_v6, %v1441_v61 }
 0x283   : > { %vm1687_vm6 = vcmp.gt.f32.partialorder %v1685_v7, 0.0  ;;  %v1689_v9 = vmul.f32 0.02, %v1685_v7 }
 0x284   : > { %vm1686_vm7 = vcmp.gt.f32.partialorder %v1684_v8, 0.0  ;;  %v1688_v10 = vmul.f32 0.02, %v1684_v8 }
 0x285   : > { %v1691_v11 = vsel %vm1687_vm6, %v1685_v7, %v1689_v9 }
 0x286   : > { %1693 = vst.msk [vmem:[#allocation2 + $0xb] sm:$0xff] %vm825_vm4, %v1691_v11  ;;  %v1690_v12 = vsel %vm1686_vm7, %v1684_v8, %v1688_v10 }
 0x287   : > { %1692 = vst.msk [vmem:[#allocation2 + $0x3] sm:$0xff] %vm825_vm4, %v1690_v12 }
 0x28d   : > { %v2035_v22 = vld [vmem:[#allocation2 + $0xc] sm:$0xff] }
 0x28e   : > { %v1697_v13 = vld [vmem:[#allocation2 + $0x1] sm:$0xff]  ;;  %v1698_v14 = vld [vmem:[#allocation2 + $0x9] sm:$0xff] }
 0x28f   : > { %2887 = vmatprep.mubr.msk.f32.mxu1 %vm825_vm4, %v1697_v13  ;;  %v1694_v16 = vld [vmem:[#allocation2] sm:$0xff]  ;;  %v1695_v17 = vld [vmem:[#allocation2 + $0x8] sm:$0xff] }
 0x290   : > { %2888 = vmatmul.mubr.msk.f32.vlgmr.msra.gmra.mrb[2].mxu1 %vm825_vm4, %v1698_v14  ;;  %v1862_v18 = vld [vmem:[#allocation2 + $0x2] sm:$0xff]  ;;  %v1863_v19 = vld [vmem:[#allocation2 + $0xa] sm:$0xff] }
 0x291   : > { %2891 = vmatpush3.msra.mxu1 %v3416_v15  ;;  %2892 = vmatprep.mubr.msk.f32.mxu1 %vm825_vm4, %v1694_v16  ;;  %v1948_v20 = vld [vmem:[#allocation2 + $0x3] sm:$0xff]  ;;  %v1949_v15 = vld [vmem:[#allocation2 + $0xb] sm:$0xff] }
 0x292   : > { %2895 = vmatprep.subr.mxu1 %v3435_v37  ;;  %v2034_v21 = vld [vmem:[#allocation2 + $0x4] sm:$0xff]  ;;  %v2121_v24 = vld [vmem:[#allocation2 + $0xd] sm:$0xff] }
 0x293   : > { %v2120_v23 = vld [vmem:[#allocation2 + $0x5] sm:$0xff]  ;;  %v2207_v27 = vld [vmem:[#allocation2 + $0xe] sm:$0xff] }
 0x294   : > { %v2206_v26 = vld [vmem:[#allocation2 + $0x6] sm:$0xff] }
 0x298   : > { %2893 = vmatmul.mubr.msk.f32.vlgmr.msra.gmra.mrb[2].mxu1 %vm825_vm4, %v1695_v17 }
 0x299   : > { %2896 = vmatpush3.msra.mxu1 %v3435_v37  ;;  %2897 = vmatprep.mubr.msk.f32.mxu1 %vm825_vm4, %v1862_v18 }
 0x29a   : > { %2900 = vmatprep.subr.mxu1 %v3446_v42 }
 0x2a0   : > { %2898 = vmatmul.mubr.msk.f32.vlgmr.msra.gmra.mrb[2].mxu1 %vm825_vm4, %v1863_v19 }
 0x2a1   : > { %2901 = vmatpush3.msra.mxu1 %v3446_v42  ;;  %2902 = vmatprep.mubr.msk.f32.mxu1 %vm825_vm4, %v1948_v20 }
 0x2a2   : > { %2905 = vmatprep.subr.mxu1 %v3457_v43 }
 0x2a8   : > { %2903 = vmatmul.mubr.msk.f32.vlgmr.msra.gmra.mrb[2].mxu1 %vm825_vm4, %v1949_v15 }
 0x2a9   : > { %2906 = vmatpush3.msra.mxu1 %v3457_v43  ;;  %2907 = vmatprep.mubr.msk.f32.mxu1 %vm825_vm4, %v2034_v21 }
 0x2aa   : > { %2910 = vmatprep.subr.mxu1 %v3466_v46 }
 0x2b0   : > { %2908 = vmatmul.mubr.msk.f32.vlgmr.msra.gmra.mrb[2].mxu1 %vm825_vm4, %v2035_v22 }
 0x2b1   : > { %2911 = vmatpush3.msra.mxu1 %v3466_v46  ;;  %2912 = vmatprep.mubr.msk.f32.mxu1 %vm825_vm4, %v2120_v23 }
 0x2b2   : > { %2915 = vmatprep.subr.mxu1 %v3475_v47 }
 0x2b8   : > { %2913 = vmatmul.mubr.msk.f32.vlgmr.msra.gmra.mrb[2].mxu1 %vm825_vm4, %v2121_v24 }
 0x2b9   : > { %2916 = vmatpush3.msra.mxu1 %v3475_v47  ;;  %2917 = vmatprep.mubr.msk.f32.mxu1 %vm825_vm4, %v2206_v26 }
 0x2ba   : > { %2920 = vmatprep.subr.mxu1 %v2305_v25 }
 0x2c0   : > { %2918 = vmatmul.mubr.msk.f32.vlgmr.msra.gmra.mrb[2].mxu1 %vm825_vm4, %v2207_v27 }
 0x2c1   : > { %2921 = vmatpush3.msra.mxu1 %v2305_v25  ;;  %2922 = vmatprep.mubr.msk.f32.mxu1 %vm825_vm4, %v1948_v20 }
 0x2c2   : > { %2925 = vmatprep.subr.mxu1 %v2303_v28 }
 0x2c8   : > { %2923 = vmatmul.mubr.msk.f32.vlgmr.msra.gmra.mrb[2].mxu1 %vm825_vm4, %v1949_v15 }
 0x2c9   : > { %2926 = vmatpush3.msra.mxu1 %v2303_v28  ;;  %2927 = vmatprep.mubr.msk.f32.mxu1 %vm825_vm4, %v1862_v18 }
 0x2ca   : > { %2930 = vmatprep.subr.mxu1 %v2457_v29 }
 0x2d0   : > { %2928 = vmatmul.mubr.msk.f32.vlgmr.msra.gmra.mrb[2].mxu1 %vm825_vm4, %v1863_v19 }
 0x2d1   : > { %2931 = vmatpush3.msra.mxu1 %v2457_v29  ;;  %2932 = vmatprep.mubr.msk.f32.mxu1 %vm825_vm4, %v2034_v21 }
 0x2d8   : > { %2933 = vmatmul.mubr.msk.f32.vlgmr.msra.gmra.mrb[2].mxu1 %vm825_vm4, %v2035_v22 }
 0x3ab   : > { %v2934_v30 = vpop.f32.mrb[2].mxu1 }
 0x3ac   : > { %v2938_v32 = vadd.f32 %v3495_v2, %v2934_v30  ;;  %v2524_v33 = vpop.f32.mrb[3].mxu1 }
 0x3ad   : > { %v2941_v34 = vadd.f32 %v3497_v4, %v2524_v33 }
 0x3ae   : > { %v2939_v35 = vadd.f32 %v2938_v32, %v2738_v31 }
 0x3af   : > { %v2942_v36 = vadd.f32 %v2941_v34, %v2738_v31 }
 0x3b0   : > { %vm2547_vm8 = vcmp.gt.f32.partialorder %v2939_v35, 0.0  ;;  %v2549_v37 = vmul.f32 0.02, %v2939_v35 }
 0x3b1   : > { %vm2546_vm9 = vcmp.gt.f32.partialorder %v2942_v36, 0.0  ;;  %v2548_v38 = vmul.f32 0.02, %v2942_v36 }
 0x3b2   : > { %v2551_v39 = vsel %vm2547_vm8, %v2939_v35, %v2549_v37 }
 0x3b3   : > { %2553 = vst.msk [vmem:[%s441_s23 + $0x8] sm:$0xff] %vm825_vm4, %v2551_v39  ;;  %v2550_v40 = vsel %vm2546_vm9, %v2942_v36, %v2548_v38 }
 0x3b4   : > { %2552 = vst.msk [vmem:[%s441_s23] sm:$0xff] %vm825_vm4, %v2550_v40 }
 0x3b5 PF: > { %s3570_s24 = sld [smem:[#allocation13_spill]] }
 0x3bb   : > { %s24_s17 = sadd.s32 1, %s3570_s24  }
 0x3bc   : > { %p21_p6 = scmp.ge.s32.totalorder %s24_s17, 4  }
 0x3be   :  { %23 = sbr.rel (!%p21_p6) target bundleno = 3 (0x3), region = 123 }
 0x3c5   :  { %2575 = vsyncpa [#allocation4], 1 }
 0x3c6   :  { %2577 = vsyncpa [#allocation4 + $0x1], 1 }
 0x3c7   :  { %2578 = vsyncpa [#allocation6], 1 }
 0x3c8   :  { %2579 = vsyncpa [#allocation9], 1 }

</bundles_post_ra>
